<compile_context>
chip_gen: v6e
topology: v6e:2x2x1
jax: 0.10.0
libtpu: 0.0.40
codegen_flags: <defaults>
</compile_context>

<pallas_src>
import functools

import jax
import jax.numpy as jnp
from jax.experimental import pallas as pl
from jax.experimental.pallas import tpu as pltpu

MAX_TL = 32768        # max spatial lanes per grid step
MAX_NB = 8            # max batch elements blocked into one grid step
TARGET_LANES = 4096   # aim for at least this many lanes of work per step


def ddpm_schedules(beta1, beta2, T):
    """Standard linear-beta DDPM schedule (length T+1 so t in [1, T) indexes safely)."""
    beta_t = (beta2 - beta1) * jnp.arange(0, T + 1, dtype=jnp.float32) / T + beta1
    alpha_t = 1.0 - beta_t
    alpha_bar_t = jnp.exp(jnp.cumsum(jnp.log(alpha_t)))
    sigma_t = jnp.sqrt(beta_t)
    return {"alpha": alpha_t, "alpha_bar": alpha_bar_t, "sigma": sigma_t}


def _pick_tile(hw, max_tl=MAX_TL):
    """Spatial lane-tile: full hw if small, else a large multiple of 128."""
    if hw <= max_tl:
        return hw
    cap = max_tl - max_tl % 128
    for tl in range(cap, 127, -128):
        if hw % tl == 0:
            return tl                      # exact multiple-of-128 divisor
    return cap                             # remainder tile handled by in-kernel mask


def _pick_batch_block(n, hw, tl):
    """For tiny images, block several batch elements per grid step."""
    if tl != hw:
        return 1
    nb = 1
    while (nb * 2 <= MAX_NB and n % (nb * 2) == 0 and nb * hw < TARGET_LANES):
        nb *= 2
    return nb


def ddpm_kernel(x_ref, eps_ref,                    # (NB, C, TL) f32 data tiles
                w1x_ref, w1e_ref, bias_ref,        # per-batch folded layer-1 (bf16/f32)
                w2t_ref, b2_ref,                   # resident layer-2 (bf16/f32)
                out_ref,                           # (1, 1, 1, 1) partial SSE
                *, nb, hw, tl):
    w2t = w2t_ref[...]                             # (C, Hd) bf16, resident
    b2 = b2_ref[...]                               # (C, 1)  f32

    sq = None
    for i in range(nb):                            # static unroll over batch block
        x = x_ref[i]                               # (C, TL) f32
        eps = eps_ref[i]                           # (C, TL) f32
        xb = x.astype(jnp.bfloat16)
        eb = eps.astype(jnp.bfloat16)

        # h = w1^T @ (sab*x + s1mab*eps) + (b1 + (t/T)*wt); q-sample scaling is
        # pre-folded into the per-batch bf16 weights, bias is a hoisted column.
        h = (jnp.dot(w1x_ref[i], xb, preferred_element_type=jnp.float32)
             + jnp.dot(w1e_ref[i], eb, preferred_element_type=jnp.float32))
        h = jnp.maximum(h + bias_ref[i], 0.0)      # (Hd, TL) f32

        pred = jnp.dot(w2t, h.astype(jnp.bfloat16),
                       preferred_element_type=jnp.float32) + b2   # (C, TL) f32

        d = eps - pred                             # MSE target stays f32
        dd = d * d
        sq = dd if sq is None else sq + dd

    if hw % tl != 0:
        # mask out-of-range tail lanes of the last (partial) spatial tile
        s = pl.program_id(1)
        lane = jax.lax.broadcasted_iota(jnp.int32, sq.shape, 1)
        sq = jnp.where(lane < (hw - s * tl), sq, 0.0)

    out_ref[...] = jnp.reshape(jnp.sum(sq), (1, 1, 1, 1))


def ddpm_forward_loss(x_nchw, t, eps_nchw, alpha_bar, T, params):
    """Pallas implementation of DDPM.forward (given pre-sampled t and eps)."""
    N, C, H, W = x_nchw.shape
    HW = H * W
    TL = _pick_tile(HW)
    NB = _pick_batch_block(N, HW, TL)
    G = N // NB
    S = -(-HW // TL)

    # lane-dense views; metadata-only reshapes (no extra HBM pass, f32 streamed)
    x = x_nchw.reshape(N, C, HW)
    eps = eps_nchw.reshape(N, C, HW)

    w1, b1, wt, w2, b2 = params
    Hd = w1.shape[1]

    sab = jnp.sqrt(alpha_bar[t]).astype(jnp.float32)            # (N,)
    s1mab = jnp.sqrt(1.0 - alpha_bar[t]).astype(jnp.float32)    # (N,)
    tn = t.astype(jnp.float32) / jnp.float32(T)                 # (N,)

    w1t = w1.T.astype(jnp.float32)                               # (Hd, C)
    # per-batch augmented first-layer weights (q-sample folded), bf16 for MXU
    w1x = (sab[:, None, None] * w1t[None]).astype(jnp.bfloat16)   # (N, Hd, C)
    w1e = (s1mab[:, None, None] * w1t[None]).astype(jnp.bfloat16)  # (N, Hd, C)
    # per-batch time-conditioned bias column (hoisted: one broadcast-add/tile)
    bias = (b1.reshape(1, Hd, 1)
            + tn[:, None, None] * wt.reshape(1, Hd, 1)).astype(jnp.float32)  # (N, Hd, 1)
    w2t = w2.T.astype(jnp.bfloat16)                              # (C, Hd)
    b2c = b2.reshape(C, 1).astype(jnp.float32)                   # (C, 1)

    kernel = functools.partial(ddpm_kernel, nb=NB, hw=HW, tl=TL)

    data_spec = pl.BlockSpec((NB, C, TL), lambda g, s: (g, 0, s))
    per_batch = lambda shape: pl.BlockSpec((NB,) + shape, lambda g, s: (g, 0, 0))
    resident = lambda a: pl.BlockSpec(a.shape, lambda g, s: (0, 0))

    out = pl.pallas_call(
        kernel,
        out_shape=jax.ShapeDtypeStruct((G, S, 1, 1), jnp.float32),
        grid=(G, S),
        in_specs=[
            data_spec, data_spec,                 # x, eps (f32)
            per_batch((Hd, C)), per_batch((Hd, C)), per_batch((Hd, 1)),
            resident(w2t), resident(b2c),
        ],
        out_specs=pl.BlockSpec((1, 1, 1, 1), lambda g, s: (g, s, 0, 0)),
        compiler_params=pltpu.CompilerParams(
            dimension_semantics=("parallel", "parallel"),
            vmem_limit_bytes=48 * 1024 * 1024),
    )(x, eps, w1x, w1e, bias, w2t, b2c)

    # out[g, s] = partial sum of squared errors; final mean over N*C*H*W
    return jnp.sum(out) / jnp.float32(N * C * HW)


def _reference_loss(x_nchw, t, eps_nchw, alpha_bar, T, params):
    """Pure-f32 JAX reference of the same forward pass (no bf16 mirroring)."""
    w1, b1, wt, w2, b2 = params
    N, C, H, W = x_nchw.shape
    sab = jnp.sqrt(alpha_bar[t])[:, None, None, None]
    s1mab = jnp.sqrt(1.0 - alpha_bar[t])[:, None, None, None]
    x_t = sab * x_nchw + s1mab * eps_nchw
    xt = jnp.transpose(x_t, (0, 2, 3, 1)).reshape(N * H * W, C)
    tn = jnp.repeat(t.astype(jnp.float32) / T, H * W).reshape(-1, 1)
    h = jnp.maximum(xt @ w1 + b1 + tn * wt, 0.0)
    pred = h @ w2 + b2
    eps_flat = jnp.transpose(eps_nchw, (0, 2, 3, 1)).reshape(N * H * W, C)
    return jnp.mean((eps_flat - pred) ** 2)


if __name__ == "__main__":
    key = jax.random.PRNGKey(0)
    kx, kt, keps, kw1, kwt, kw2 = jax.random.split(key, 6)

    N, C, H, W = 2, 4, 16, 16
    Hd = 32
    T = 100
    betas = (1e-4, 0.02)

    x = jax.random.normal(kx, (N, C, H, W), jnp.float32)
    # t = torch.randint(1, T, (N,)); eps = torch.randn_like(x) -> sampled in glue
    t = jax.random.randint(kt, (N,), 1, T)
    eps = jax.random.normal(keps, (N, C, H, W), jnp.float32)

    sched = ddpm_schedules(betas[0], betas[1], T)

    # TODO(synk): eps_model is an arbitrary injected nn.Module in the reference;
    # here it is a fixed deterministic per-pixel MLP with time conditioning.
    w1 = 0.1 * jax.random.normal(kw1, (C, Hd), jnp.float32)
    b1 = jnp.zeros((1, Hd), jnp.float32)
    wt = 0.1 * jax.random.normal(kwt, (1, Hd), jnp.float32)
    w2 = 0.1 * jax.random.normal(kw2, (Hd, C), jnp.float32)
    b2 = jnp.zeros((1, C), jnp.float32)
    params = (w1, b1, wt, w2, b2)

    loss = ddpm_forward_loss(x, t, eps, sched["alpha_bar"], T, params)
    loss = jax.block_until_ready(loss)

    ref = _reference_loss(x, t, eps, sched["alpha_bar"], T, params)
    # bf16 MXU operands vs a pure-f32 reference -> compare at bf16-appropriate tolerance
    assert jnp.allclose(loss, ref, rtol=1e-2, atol=1e-3), (loss, ref)

    print("KERNEL_OK")
</pallas_src>

<mosaic_0001>
module attributes {stable_mosaic.version = 11 : i64} {
  func.func @ddpm_kernel(%arg0: i32, %arg1: i32, %arg2: memref<2x4x256xf32, #tpu.memory_space<vmem>>, %arg3: memref<2x4x256xf32, #tpu.memory_space<vmem>>, %arg4: memref<2x32x4xbf16, #tpu.memory_space<vmem>>, %arg5: memref<2x32x4xbf16, #tpu.memory_space<vmem>>, %arg6: memref<2x32x1xf32, #tpu.memory_space<vmem>>, %arg7: memref<4x32xbf16, #tpu.memory_space<vmem>>, %arg8: memref<4x1xf32, #tpu.memory_space<vmem>>, %arg9: memref<1x1x1x1xf32, #tpu.memory_space<vmem>>) attributes {dimension_semantics = [#tpu.dimension_semantics<parallel>, #tpu.dimension_semantics<parallel>], iteration_bounds = array<i64: 1, 1>, scalar_prefetch = 0 : i64, scratch_operands = 0 : i64, tpu.core_type = #tpu.core_type<tc>, window_params = [{transform_indices = @transform_0, window_bounds = array<i64: 2, 4, 256>}, {transform_indices = @transform_1, window_bounds = array<i64: 2, 4, 256>}, {transform_indices = @transform_2, window_bounds = array<i64: 2, 32, 4>}, {transform_indices = @transform_3, window_bounds = array<i64: 2, 32, 4>}, {transform_indices = @transform_4, window_bounds = array<i64: 2, 32, 1>}, {pipeline_mode = #tpu.pipeline_mode<synchronous>, transform_indices = @transform_5, window_bounds = array<i64: 4, 32>}, {pipeline_mode = #tpu.pipeline_mode<synchronous>, transform_indices = @transform_6, window_bounds = array<i64: 4, 1>}, {transform_indices = @transform_7, window_bounds = array<i64: 1, 1, 1, 1>}]} {
    %c0 = arith.constant 0 : index
    %c0_0 = arith.constant 0 : index
    %0 = vector.load %arg7[%c0, %c0_0] : memref<4x32xbf16, #tpu.memory_space<vmem>>, vector<4x32xbf16>
    %c0_1 = arith.constant 0 : index
    %c0_2 = arith.constant 0 : index
    %1 = vector.load %arg8[%c0_1, %c0_2] : memref<4x1xf32, #tpu.memory_space<vmem>>, vector<4x1xf32>
    %c0_3 = arith.constant 0 : index
    %c0_4 = arith.constant 0 : index
    %c0_5 = arith.constant 0 : index
    %2 = vector.load %arg2[%c0_3, %c0_4, %c0_5] : memref<2x4x256xf32, #tpu.memory_space<vmem>>, vector<1x4x256xf32>
    %3 = vector.shape_cast %2 : vector<1x4x256xf32> to vector<4x256xf32>
    %c0_6 = arith.constant 0 : index
    %c0_7 = arith.constant 0 : index
    %c0_8 = arith.constant 0 : index
    %4 = vector.load %arg3[%c0_6, %c0_7, %c0_8] : memref<2x4x256xf32, #tpu.memory_space<vmem>>, vector<1x4x256xf32>
    %5 = vector.shape_cast %4 : vector<1x4x256xf32> to vector<4x256xf32>
    %6 = arith.truncf %3 : vector<4x256xf32> to vector<4x256xbf16>
    %7 = arith.truncf %5 : vector<4x256xf32> to vector<4x256xbf16>
    %c0_9 = arith.constant 0 : index
    %c0_10 = arith.constant 0 : index
    %c0_11 = arith.constant 0 : index
    %8 = vector.load %arg4[%c0_9, %c0_10, %c0_11] : memref<2x32x4xbf16, #tpu.memory_space<vmem>>, vector<1x32x4xbf16>
    %9 = vector.shape_cast %8 : vector<1x32x4xbf16> to vector<32x4xbf16>
    %cst = arith.constant dense<0.000000e+00> : vector<32x256xf32>
    %10 = tpu.matmul %9, %6, %cst {dimension_numbers = #tpu.dot_dimension_numbers<[1], [0], [0], [1], [0, 0, 1, 1], [], []>} : vector<32x4xbf16>, vector<4x256xbf16>, vector<32x256xf32> -> vector<32x256xf32>
    %c0_12 = arith.constant 0 : index
    %c0_13 = arith.constant 0 : index
    %c0_14 = arith.constant 0 : index
    %11 = vector.load %arg5[%c0_12, %c0_13, %c0_14] : memref<2x32x4xbf16, #tpu.memory_space<vmem>>, vector<1x32x4xbf16>
    %12 = vector.shape_cast %11 : vector<1x32x4xbf16> to vector<32x4xbf16>
    %cst_15 = arith.constant dense<0.000000e+00> : vector<32x256xf32>
    %13 = tpu.matmul %12, %7, %cst_15 {dimension_numbers = #tpu.dot_dimension_numbers<[1], [0], [0], [1], [0, 0, 1, 1], [], []>} : vector<32x4xbf16>, vector<4x256xbf16>, vector<32x256xf32> -> vector<32x256xf32>
    %14 = arith.addf %10, %13 : vector<32x256xf32>
    %c0_16 = arith.constant 0 : index
    %c0_17 = arith.constant 0 : index
    %c0_18 = arith.constant 0 : index
    %15 = vector.load %arg6[%c0_16, %c0_17, %c0_18] : memref<2x32x1xf32, #tpu.memory_space<vmem>>, vector<1x32x1xf32>
    %16 = vector.shape_cast %15 : vector<1x32x1xf32> to vector<32x1xf32>
    %17 = vector.broadcast %16 : vector<32x1xf32> to vector<32x256xf32>
    %18 = arith.addf %14, %17 : vector<32x256xf32>
    %cst_19 = arith.constant 0.000000e+00 : f32
    %19 = vector.broadcast %cst_19 : f32 to vector<32x256xf32>
    %20 = arith.maximumf %18, %19 : vector<32x256xf32>
    %21 = arith.truncf %20 : vector<32x256xf32> to vector<32x256xbf16>
    %cst_20 = arith.constant dense<0.000000e+00> : vector<4x256xf32>
    %22 = tpu.matmul %0, %21, %cst_20 {dimension_numbers = #tpu.dot_dimension_numbers<[1], [0], [0], [1], [0, 0, 1, 1], [], []>} : vector<4x32xbf16>, vector<32x256xbf16>, vector<4x256xf32> -> vector<4x256xf32>
    %23 = vector.broadcast %1 : vector<4x1xf32> to vector<4x256xf32>
    %24 = arith.addf %22, %23 : vector<4x256xf32>
    %25 = arith.subf %5, %24 : vector<4x256xf32>
    %26 = arith.mulf %25, %25 : vector<4x256xf32>
    %c1 = arith.constant 1 : index
    %c0_21 = arith.constant 0 : index
    %c0_22 = arith.constant 0 : index
    %27 = vector.load %arg2[%c1, %c0_21, %c0_22] : memref<2x4x256xf32, #tpu.memory_space<vmem>>, vector<1x4x256xf32>
    %28 = vector.shape_cast %27 : vector<1x4x256xf32> to vector<4x256xf32>
    %c1_23 = arith.constant 1 : index
    %c0_24 = arith.constant 0 : index
    %c0_25 = arith.constant 0 : index
    %29 = vector.load %arg3[%c1_23, %c0_24, %c0_25] : memref<2x4x256xf32, #tpu.memory_space<vmem>>, vector<1x4x256xf32>
    %30 = vector.shape_cast %29 : vector<1x4x256xf32> to vector<4x256xf32>
    %31 = arith.truncf %28 : vector<4x256xf32> to vector<4x256xbf16>
    %32 = arith.truncf %30 : vector<4x256xf32> to vector<4x256xbf16>
    %c1_26 = arith.constant 1 : index
    %c0_27 = arith.constant 0 : index
    %c0_28 = arith.constant 0 : index
    %33 = vector.load %arg4[%c1_26, %c0_27, %c0_28] : memref<2x32x4xbf16, #tpu.memory_space<vmem>>, vector<1x32x4xbf16>
    %34 = vector.shape_cast %33 : vector<1x32x4xbf16> to vector<32x4xbf16>
    %cst_29 = arith.constant dense<0.000000e+00> : vector<32x256xf32>
    %35 = tpu.matmul %34, %31, %cst_29 {dimension_numbers = #tpu.dot_dimension_numbers<[1], [0], [0], [1], [0, 0, 1, 1], [], []>} : vector<32x4xbf16>, vector<4x256xbf16>, vector<32x256xf32> -> vector<32x256xf32>
    %c1_30 = arith.constant 1 : index
    %c0_31 = arith.constant 0 : index
    %c0_32 = arith.constant 0 : index
    %36 = vector.load %arg5[%c1_30, %c0_31, %c0_32] : memref<2x32x4xbf16, #tpu.memory_space<vmem>>, vector<1x32x4xbf16>
    %37 = vector.shape_cast %36 : vector<1x32x4xbf16> to vector<32x4xbf16>
    %cst_33 = arith.constant dense<0.000000e+00> : vector<32x256xf32>
    %38 = tpu.matmul %37, %32, %cst_33 {dimension_numbers = #tpu.dot_dimension_numbers<[1], [0], [0], [1], [0, 0, 1, 1], [], []>} : vector<32x4xbf16>, vector<4x256xbf16>, vector<32x256xf32> -> vector<32x256xf32>
    %39 = arith.addf %35, %38 : vector<32x256xf32>
    %c1_34 = arith.constant 1 : index
    %c0_35 = arith.constant 0 : index
    %c0_36 = arith.constant 0 : index
    %40 = vector.load %arg6[%c1_34, %c0_35, %c0_36] : memref<2x32x1xf32, #tpu.memory_space<vmem>>, vector<1x32x1xf32>
    %41 = vector.shape_cast %40 : vector<1x32x1xf32> to vector<32x1xf32>
    %42 = vector.broadcast %41 : vector<32x1xf32> to vector<32x256xf32>
    %43 = arith.addf %39, %42 : vector<32x256xf32>
    %cst_37 = arith.constant 0.000000e+00 : f32
    %44 = vector.broadcast %cst_37 : f32 to vector<32x256xf32>
    %45 = arith.maximumf %43, %44 : vector<32x256xf32>
    %46 = arith.truncf %45 : vector<32x256xf32> to vector<32x256xbf16>
    %cst_38 = arith.constant dense<0.000000e+00> : vector<4x256xf32>
    %47 = tpu.matmul %0, %46, %cst_38 {dimension_numbers = #tpu.dot_dimension_numbers<[1], [0], [0], [1], [0, 0, 1, 1], [], []>} : vector<4x32xbf16>, vector<32x256xbf16>, vector<4x256xf32> -> vector<4x256xf32>
    %48 = vector.broadcast %1 : vector<4x1xf32> to vector<4x256xf32>
    %49 = arith.addf %47, %48 : vector<4x256xf32>
    %50 = arith.subf %30, %49 : vector<4x256xf32>
    %51 = arith.mulf %50, %50 : vector<4x256xf32>
    %52 = arith.addf %26, %51 : vector<4x256xf32>
    %53 = vector.shape_cast %52 : vector<4x256xf32> to vector<1x4x256xf32>
    %cst_39 = arith.constant dense<0.000000e+00> : vector<1xf32>
    %54 = vector.multi_reduction <add>, %53, %cst_39 [1, 2] : vector<1x4x256xf32> to vector<1xf32>
    %55 = vector.shape_cast %54 : vector<1xf32> to vector<1x1x1xf32>
    %56 = vector.extract %55[0, 0, 0] : f32 from vector<1x1x1xf32>
    %57 = vector.broadcast %56 : f32 to vector<1x1x1x1xf32>
    %c0_40 = arith.constant 0 : index
    %c0_41 = arith.constant 0 : index
    %c0_42 = arith.constant 0 : index
    %c0_43 = arith.constant 0 : index
    %58 = vector.load %arg9[%c0_40, %c0_41, %c0_42, %c0_43] : memref<1x1x1x1xf32, #tpu.memory_space<vmem>>, vector<1x1x1x1xf32>
    tpu.vector_store %arg9[%c0_40, %c0_41, %c0_42, %c0_43], %57 {strides = array<i32>} : memref<1x1x1x1xf32, #tpu.memory_space<vmem>>, vector<1x1x1x1xf32>,
    return
  }
  func.func @transform_0(%arg0: i32, %arg1: i32) -> (i32, i32, i32) {
    %c0_i32 = arith.constant 0 : i32
    %c0_i32_0 = arith.constant 0 : i32
    return %arg0, %c0_i32, %arg1 : i32, i32, i32
  }
  func.func @transform_1(%arg0: i32, %arg1: i32) -> (i32, i32, i32) {
    %c0_i32 = arith.constant 0 : i32
    %c0_i32_0 = arith.constant 0 : i32
    return %arg0, %c0_i32, %arg1 : i32, i32, i32
  }
  func.func @transform_2(%arg0: i32, %arg1: i32) -> (i32, i32, i32) {
    %c0_i32 = arith.constant 0 : i32
    %c0_i32_0 = arith.constant 0 : i32
    %c0_i32_1 = arith.constant 0 : i32
    return %arg0, %c0_i32, %c0_i32_0 : i32, i32, i32
  }
  func.func @transform_3(%arg0: i32, %arg1: i32) -> (i32, i32, i32) {
    %c0_i32 = arith.constant 0 : i32
    %c0_i32_0 = arith.constant 0 : i32
    %c0_i32_1 = arith.constant 0 : i32
    return %arg0, %c0_i32, %c0_i32_0 : i32, i32, i32
  }
  func.func @transform_4(%arg0: i32, %arg1: i32) -> (i32, i32, i32) {
    %c0_i32 = arith.constant 0 : i32
    %c0_i32_0 = arith.constant 0 : i32
    %c0_i32_1 = arith.constant 0 : i32
    return %arg0, %c0_i32, %c0_i32_0 : i32, i32, i32
  }
  func.func @transform_5(%arg0: i32, %arg1: i32) -> (i32, i32) {
    %c0_i32 = arith.constant 0 : i32
    %c0_i32_0 = arith.constant 0 : i32
    %c0_i32_1 = arith.constant 0 : i32
    return %c0_i32, %c0_i32_0 : i32, i32
  }
  func.func @transform_6(%arg0: i32, %arg1: i32) -> (i32, i32) {
    %c0_i32 = arith.constant 0 : i32
    %c0_i32_0 = arith.constant 0 : i32
    %c0_i32_1 = arith.constant 0 : i32
    return %c0_i32, %c0_i32_0 : i32, i32
  }
  func.func @transform_7(%arg0: i32, %arg1: i32) -> (i32, i32, i32, i32) {
    %c0_i32 = arith.constant 0 : i32
    %c0_i32_0 = arith.constant 0 : i32
    %c0_i32_1 = arith.constant 0 : i32
    return %arg0, %arg1, %c0_i32, %c0_i32_0 : i32, i32, i32, i32
  }
}

</mosaic_0001>

<bundles_post_ra>
// kernel: tpu_custom_call.1
= control target key start
LH: loop header
LB: loop body
LE: loop exit
PB: predicated region body
PF: predicated region fallthrough
CT: control target
= control target key end

     0   :  { %vm67_vm0 = vcmask 1041408   ;;  %v678_v6 = vmov 0   ;;  %vm60_vm1 = vcmask 31744   ;;  %s837_s0 = inlined_call_operand.vmem [shape: f32[2,4,256], index: 0, kind: input, shape index: {}]   ;;  %s838_s1 = inlined_call_operand.vmem [shape: f32[2,4,256], index: 1, kind: input, shape index: {}]   ;;  %s839_s2 = inlined_call_operand.vmem [shape: bf16[2,32,4], index: 2, kind: input, shape index: {}]   ;;  %s840_s3 = inlined_call_operand.vmem [shape: bf16[2,32,4], index: 3, kind: input, shape index: {}]   ;;  %s841_s4 = inlined_call_operand.vmem [shape: f32[2,32,1], index: 4, kind: input, shape index: {}]   ;;  %s842_s5 = inlined_call_operand.vmem [shape: bf16[4,32], index: 5, kind: input, shape index: {}]   ;;  %s843_s6 = inlined_call_operand.vmem [shape: f32[4,1], index: 6, kind: input, shape index: {}]   ;;  %s844_s7 = inlined_call_operand.hbm [shape: f32[1,1,1,1], index: 7, kind: output, shape index: {}]  }
   0x1   :  { %v723_v0 = vld [vmem:[%s838_s1] sm:$0xff]  ;;  %106 = vmatprep.mubr.bf16.mxu0 %v678_v6  ;;  %181 = vmatprep.mubr.bf16.mxu1 %v678_v6  ;;  %v204_v11 = vld [vmem:[%s841_s4 + $0x10] sm:$0xff]  ;;  %v205_v15 = vld [vmem:[%s841_s4 + $0x18] sm:$0xff] }
   0x2   :  { %v30_v1 = vld [vmem:[%s837_s0] sm:$0xff]  ;;  %v38_v2 = vcombine.high %v723_v0, %v723_v0  ;;  %v40_v4 = vpack.c.bf16 %v723_v0, %v723_v0  ;;  %642 = vset.pattern.permute.xlu0 %v678_v6  ;;  %643 = vset.pattern.permute.xlu1 %v678_v6  ;;  %v203_v16 = vld [vmem:[%s841_s4 + $0x8] sm:$0xff] }
   0x3   :  { %v33_v3 = vcombine.high %v30_v1, %v30_v1  ;;  %v35_v5 = vpack.c.bf16 %v30_v1, %v30_v1  ;;  %v646_v12 = vld [vmem:[%s840_s3] sm:$0xff]   ;;  %218 = vperm.xlu0 %642, %v204_v11  }
   0x4   :  { %v41_v7 = vpack.c.bf16 %v38_v2, %v38_v2  ;;  %v69_v9 = vsel %vm67_vm0, %v40_v4, 0  ;;  %v647_v13 = vld [vmem:[%s839_s2] sm:$0xff]  }
   0x5   :  { %v36_v8 = vpack.c.bf16 %v33_v3, %v33_v3  ;;  %v144_v10 = vsel %vm67_vm0, %v35_v5, 0  ;;  %v202_v14 = vld [vmem:[%s841_s4] sm:$0xff] }
   0x6   :  { %604 = vmatprep.subr.msk.bf16.mxu0 %vm67_vm0, %v41_v7  ;;  %208 = vperm.xlu1 %643, %v202_v14  }
   0x7   :  { %609 = vmatprep.subr.msk.bf16.mxu1 %vm67_vm0, %v36_v8  ;;  %89 = vmatpush1.bf16.msra.mxu0 %v69_v9 }
   0x8   :  { %164 = vmatpush1.bf16.msra.mxu1 %v144_v10 }
   0xa   :  { %605 = vmatmul.mubr.msk.bf16.vlgmr.msra.gmra.mxu0 %vm60_vm1, %v646_v12 }
   0xb   :  { %610 = vmatmul.mubr.msk.bf16.vlgmr.msra.gmra.mxu1 %vm60_vm1, %v647_v13  ;;  %116 = vmatprep.mubr.bf16.mxu0 %v678_v6 }
   0xc   :  { %191 = vmatprep.mubr.bf16.mxu1 %v678_v6 }
   0xd   :  { %12 = vsyncpa [#allocation3], 0  ;;  %223 = vperm.xlu0 %642, %v205_v15   ;;  %213 = vperm.xlu1 %643, %v203_v16   ;;  %v635_v17 = vld [vmem:[%s841_s4 + $0x30] sm:$0xff]  ;;  %v636_v18 = vld [vmem:[%s841_s4 + $0x38] sm:$0xff]  ;;  %vm251_vm2 = vcmask 261120   ;;  %vm572_vm3 = vcmask 1043456  }
   0xe   :  { %v648_v19 = vld [vmem:[%s840_s3 + $0x8] sm:$0xff]   ;;  %v633_v21 = vld [vmem:[%s841_s4 + $0x20] sm:$0xff]  ;;  %v651_v29 = vld [vmem:[%s840_s3 + $0x10] sm:$0xff]   ;;  %vm586_vm4 = vcmask 0  }
   0xf   :  { %v649_v20 = vld [vmem:[%s839_s2 + $0x8] sm:$0xff]   ;;  %v29_v23 = vld [vmem:[%s843_s6] sm:$0xf]  ;;  %v654_v30 = vld [vmem:[%s840_s3 + $0x18] sm:$0xff]  }
  0x10   :  { %v634_v22 = vld [vmem:[%s841_s4 + $0x28] sm:$0xff] }
  0x11   :  { %493 = vperm.xlu0 %642, %v635_v17   ;;  %498 = vperm.xlu1 %643, %v636_v18   ;;  %v790_v24 = vld [vmem:[%s838_s1 + $0x8] sm:$0xff] }
  0x12   :  { %606 = vmatmul.mubr.msk.bf16.gmra.mxu0 %vm60_vm1, %v648_v19  ;;  %v312_v25 = vcombine.high %v790_v24, %v790_v24  ;;  %v314_v27 = vpack.c.bf16 %v790_v24, %v790_v24  ;;  %v613_v4 = vld [vmem:[%s837_s0 + $0x8] sm:$0xff] }
  0x13   :  { %611 = vmatmul.mubr.msk.bf16.gmra.mxu1 %vm60_vm1, %v649_v20  ;;  %287 = vmatprep.mubr.bf16.mxu0 %v678_v6  ;;  %v307_v13 = vcombine.high %v613_v4, %v613_v4  ;;  %v309_v19 = vpack.c.bf16 %v613_v4, %v613_v4 }
  0x14   :  { %380 = vmatprep.mubr.bf16.mxu1 %v678_v6  ;;  %v315_v26 = vpack.c.bf16 %v312_v25, %v312_v25  ;;  %v343_v28 = vsel %vm67_vm0, %v314_v27, 0  ;;  %v655_v25 = vld [vmem:[%s839_s2 + $0x18] sm:$0xff]  }
  0x15   :  { %483 = vperm.xlu0 %642, %v633_v21   ;;  %488 = vperm.xlu1 %643, %v634_v22   ;;  %v310_v18 = vpack.c.bf16 %v307_v13, %v307_v13  ;;  %v814_v21 = vld [vmem:[%s842_s5] sm:$0x3]  ;;  %v418_v22 = vsel %vm67_vm0, %v309_v19, 0 }
  0x16   :  { %625 = vmatprep.subr.msk.bf16.mxu1 %vm67_vm0, %v315_v26 }
  0x17   :  { %363 = vmatpush1.bf16.msra.mxu1 %v343_v28 }
  0x19   :  { %248 = vperm.xlu0 %642, %v29_v23   ;;  %v653_v23 = vld [vmem:[%s839_s2 + $0x10] sm:$0xff]   ;;  %s679_s2 = smov [#allocation2]  }
  0x1a   :  { %s594_s16 = sshll.u32 %s679_s2, 4  ;;  %s595_s16 = int_to_ptr.vmem [resolvable:$true] %s594_s16 }
  0x1b   :  { %626 = vmatmul.mubr.msk.bf16.vlgmr.msra.gmra.mxu1 %vm60_vm1, %v651_v29  ;;  %s656_s18 = scalar_lea.vmem %s595_s16, 16  ;;  %s660_s19 = scalar_lea.vmem %s595_s16, 32 }
  0x1c   :  { %390 = vmatprep.mubr.bf16.mxu1 %v678_v6  ;;  %p657_p0 = scmp.ne.s32.totalorder %s595_s16, %s656_s18  ;;  %p661_p1 = scmp.lt.s32.totalorder %s595_s16, %s595_s16 }
  0x1d   :  { %p662_p2 = scmp.lt.s32.totalorder %s660_s19, %s656_s18 }
  0x1f   :  { %p663_p3 = por %p662_p2, %p661_p1 }
  0x21   :  { %p664_p4 = pnand %p663_p3, %p657_p0 }
  0x23   :  { %627 = vmatmul.mubr.msk.bf16.gmra.mxu1 %vm60_vm1, %v654_v30 }
  0x24   :  { %553 = vmatprep.mubr.bf16.mxu1 %v678_v6 }
  0x7e   :  { %v219_v39 = vpop.permute.xlu0 %218 }
  0x81   :  { %v209_v40 = vpop.permute.xlu1 %208 }
  0x88   :  { %v224_v50 = vpop.permute.xlu0 %223  ;;  %v214_v52 = vpop.permute.xlu1 %213 }
  0x8c   :  { %v494_v26 = vpop.permute.xlu0 %493 }
  0x90   :  { %v484_v28 = vpop.permute.xlu0 %483 }
  0xca   :  { %v108_v31 = vpop.f32.mrf.mxu0 }
  0xcb   :  { %v183_v32 = vpop.f32.mrf.mxu1 }
  0xcc   :  { %v110_v33 = vpop.f32.mrf.mxu0  ;;  %v184_v61 = vadd.f32 %v183_v32, %v108_v31  ;;  %v249_v31 = vpop.permute.xlu0 %248 }
  0xcd   :  { %v185_v34 = vpop.f32.mrf.mxu1 }
  0xce   :  { %v112_v35 = vpop.f32.mrf.mxu0  ;;  %v186_v51 = vadd.f32 %v185_v34, %v110_v33  ;;  %v226_v9 = vadd.f32 %v209_v40, %v184_v61 }
  0xcf   :  { %v187_v36 = vpop.f32.mrf.mxu1 }
  0xd0   :  { %v114_v37 = vpop.f32.mrf.mxu0  ;;  %v188_v54 = vadd.f32 %v187_v36, %v112_v35  ;;  %v227_v63 = vadd.f32 %v209_v40, %v186_v51  ;;  %v234_v17 = vmax.f32 %v226_v9, 0.0 }
  0xd1   :  { %v189_v38 = vpop.f32.mrf.mxu1 }
  0xd2   :  { %v118_v41 = vpop.f32.mrf.mxu0  ;;  %v190_v45 = vadd.f32 %v189_v38, %v114_v37  ;;  %v228_v2 = vadd.f32 %v214_v52, %v188_v54  ;;  %v235_v11 = vmax.f32 %v227_v63, 0.0 }
  0xd3   :  { %v193_v42 = vpop.f32.mrf.mxu1 }
  0xd4   :  { %v120_v43 = vpop.f32.mrf.mxu0  ;;  %v194_v47 = vadd.f32 %v193_v42, %v118_v41  ;;  %v229_v57 = vadd.f32 %v214_v52, %v190_v45  ;;  %v236_v14 = vmax.f32 %v228_v2, 0.0  ;;  %v499_v45 = vpop.permute.xlu1 %498 }
  0xd5   :  { %v195_v44 = vpop.f32.mrf.mxu1 }
  0xd6   :  { %v196_v46 = vadd.f32 %v195_v44, %v120_v43  ;;  %v122_v48 = vpop.f32.mrf.mxu0  ;;  %v230_v62 = vadd.f32 %v219_v39, %v194_v47  ;;  %v237_v5 = vmax.f32 %v229_v57, 0.0  ;;  %v242_v20 = vpack.c.bf16 %v236_v14, %v234_v17 }
  0xd7   :  { %v197_v49 = vpop.f32.mrf.mxu1 }
  0xd8   :  { %v198_v53 = vadd.f32 %v197_v49, %v122_v48  ;;  %v124_v55 = vpop.f32.mrf.mxu0  ;;  %v231_v58 = vadd.f32 %v219_v39, %v196_v46  ;;  %v238_v10 = vmax.f32 %v230_v62, 0.0  ;;  %v243_v16 = vpack.c.bf16 %v237_v5, %v235_v11 }
  0xd9   :  { %v199_v56 = vpop.f32.mrf.mxu1 }
  0xda   :  { %v232_v59 = vadd.f32 %v224_v50, %v198_v53  ;;  %v200_v60 = vadd.f32 %v199_v56, %v124_v55  ;;  %v239_v7 = vmax.f32 %v231_v58, 0.0  ;;  %v489_v53 = vpop.permute.xlu1 %488 }
  0xdb   :  { %v382_v27 = vpop.f32.mrf.mxu1 }
  0xdc   :  { %v233_v1 = vadd.f32 %v224_v50, %v200_v60  ;;  %v240_v3 = vmax.f32 %v232_v59, 0.0 }
  0xdd   :  { %v384_v29 = vpop.f32.mrf.mxu1 }
  0xde   :  { %v241_v8 = vmax.f32 %v233_v1, 0.0  ;;  %v244_v15 = vpack.c.bf16 %v240_v3, %v238_v10 }
  0xdf   :  { %v386_v33 = vpop.f32.mrf.mxu1 }
  0xe0   :  { %v245_v12 = vpack.c.bf16 %v241_v8, %v239_v7 }
  0xe2   :  { %267 = vmatprep.subr.bf16.mxu0 %v245_v12 }
  0xe3   :  { %268 = vmatpush1.bf16.msra.mxu0 %v244_v15 }
  0xe4   :  { %269 = vmatprep.subr.bf16.mxu0 %v243_v16 }
  0xe7   :  { %270 = vmatpush1.bf16.msra.mxu0 %v242_v20 }
  0xe8   :  { %630 = vmatprep.subr.msk.bf16.mxu0 %vm67_vm0, %v310_v18 }
  0xea   :  { %612 = vmatmul.mubr.msk.bf16.vlgmr.msra.gmra.mxu0 %vm251_vm2, %v814_v21 }
  0xeb   :  { %438 = vmatpush1.bf16.msra.mxu0 %v418_v22  ;;  %455 = vmatprep.mubr.bf16.mxu0 %v678_v6 }
  0xf2   :  { %631 = vmatmul.mubr.msk.bf16.vlgmr.msra.gmra.mxu0 %vm60_vm1, %v653_v23 }
  0xf3   :  { %465 = vmatprep.mubr.bf16.mxu0 %v678_v6  ;;  %v388_v6 = vpop.f32.mrf.mxu1 }
  0xf5   :  { %v392_v40 = vpop.f32.mrf.mxu1 }
  0xf7   :  { %v394_v43 = vpop.f32.mrf.mxu1 }
  0xf9   :  { %v396_v47 = vpop.f32.mrf.mxu1 }
  0xfa   :  { %632 = vmatmul.mubr.msk.bf16.gmra.mxu0 %vm60_vm1, %v655_v25 }
  0xfb   :  { %v398_v57 = vpop.f32.mrf.mxu1 }
 0x1aa   :  { %v289_v30 = vpop.f32.mrf.mxu0 }
 0x1ab   :  { %v290_v34 = vadd.f32 %v289_v30, %v249_v31 }
 0x1ac   :  { %v291_v32 = vpop.f32.mrf.mxu0 }
 0x1ad   :  { %v292_v35 = vadd.f32 %v291_v32, %v249_v31 }
 0x1ae   :  { %v293_v36 = vpop.f32.mrf.mxu0 }
 0x1af   :  { %v298_v37 = vcombine.low %v290_v34, %v292_v35 }
 0x1b0   :  { %v294_v38 = vpop.f32.mrf.mxu0 }
 0x1b2   :  { %v457_v39 = vpop.f32.mrf.mxu0 }
 0x1b3   :  { %v458_v63 = vadd.f32 %v457_v39, %v382_v27 }
 0x1b4   :  { %v459_v41 = vpop.f32.mrf.mxu0 }
 0x1b5   :  { %v460_v54 = vadd.f32 %v459_v41, %v384_v29  ;;  %v501_v10 = vadd.f32 %v484_v28, %v458_v63 }
 0x1b6   :  { %v461_v42 = vpop.f32.mrf.mxu0 }
 0x1b7   :  { %v462_v56 = vadd.f32 %v461_v42, %v386_v33  ;;  %v502_v2 = vadd.f32 %v484_v28, %v460_v54  ;;  %v509_v17 = vmax.f32 %v501_v10, 0.0 }
 0x1b8   :  { %v463_v44 = vpop.f32.mrf.mxu0 }
 0x1b9   :  { %v464_v49 = vadd.f32 %v463_v44, %v388_v6  ;;  %v503_v4 = vadd.f32 %v489_v53, %v462_v56  ;;  %v510_v12 = vmax.f32 %v502_v2, 0.0 }
 0x1ba   :  { %v467_v46 = vpop.f32.mrf.mxu0 }
 0x1bb   :  { %v468_v51 = vadd.f32 %v467_v46, %v392_v40  ;;  %v504_v59 = vadd.f32 %v489_v53, %v464_v49  ;;  %v511_v14 = vmax.f32 %v503_v4, 0.0 }
 0x1bc   :  { %v469_v48 = vpop.f32.mrf.mxu0 }
 0x1bd   :  { %v470_v50 = vadd.f32 %v469_v48, %v394_v43  ;;  %v505_v1 = vadd.f32 %v494_v26, %v468_v51  ;;  %v512_v7 = vmax.f32 %v504_v59, 0.0  ;;  %v517_v18 = vpack.c.bf16 %v511_v14, %v509_v17 }
 0x1be   :  { %v471_v52 = vpop.f32.mrf.mxu0 }
 0x1bf   :  { %v472_v55 = vadd.f32 %v471_v52, %v396_v47  ;;  %v506_v60 = vadd.f32 %v494_v26, %v470_v50  ;;  %v513_v11 = vmax.f32 %v505_v1, 0.0  ;;  %v518_v16 = vpack.c.bf16 %v512_v7, %v510_v12 }
 0x1c0   :  { %v473_v58 = vpop.f32.mrf.mxu0  ;;  %v300_v26 = vsub.f32 %v723_v0, %v298_v37 }
 0x1c1   :  { %v507_v61 = vadd.f32 %v499_v45, %v472_v55  ;;  %v474_v62 = vadd.f32 %v473_v58, %v398_v57  ;;  %v514_v8 = vmax.f32 %v506_v60, 0.0 }
 0x1c2   :  { %v301_v30 = vmul.f32 %v300_v26, %v300_v26 }
 0x1c3   :  { %v508_v3 = vadd.f32 %v499_v45, %v474_v62  ;;  %v515_v5 = vmax.f32 %v507_v61, 0.0 }
 0x1c5   :  { %v516_v9 = vmax.f32 %v508_v3, 0.0  ;;  %v519_v15 = vpack.c.bf16 %v515_v5, %v513_v11 }
 0x1c7   :  { %v520_v13 = vpack.c.bf16 %v516_v9, %v514_v8 }
 0x1c9   :  { %533 = vmatprep.subr.bf16.mxu1 %v520_v13 }
 0x1ca   :  { %534 = vmatpush1.bf16.msra.mxu1 %v519_v15 }
 0x1cb   :  { %535 = vmatprep.subr.bf16.mxu1 %v518_v16 }
 0x1ce   :  { %536 = vmatpush1.bf16.msra.mxu1 %v517_v18 }
 0x1d1   :  { %637 = vmatmul.mubr.msk.bf16.vlgmr.msra.gmra.mxu1 %vm251_vm2, %v814_v21 }
 0x291   :  { %v555_v19 = vpop.f32.mrf.mxu1 }
 0x292   :  { %v556_v22 = vadd.f32 %v555_v19, %v249_v31 }
 0x293   :  { %v557_v20 = vpop.f32.mrf.mxu1 }
 0x294   :  { %v558_v23 = vadd.f32 %v557_v20, %v249_v31 }
 0x295   :  { %v559_v25 = vpop.f32.mrf.mxu1 }
 0x296   :  { %v564_v27 = vcombine.low %v556_v22, %v558_v23 }
 0x297   :  { %v560_v28 = vpop.f32.mrf.mxu1 }
 0x298   :  { %v566_v29 = vsub.f32 %v790_v24, %v564_v27 }
 0x29a   :  { %v567_v32 = vmul.f32 %v566_v29, %v566_v29 }
 0x29c   :  { %v568_v33 = vadd.f32 %v567_v32, %v301_v30 }
 0x29e   :  { %v570_v34 = vcombine.high %v568_v33, %v568_v33  ;;  %v573_v35 = vsel %vm572_vm3, %v568_v33, 0.0 }
 0x2a0   :  { %v574_v36 = vsel %vm572_vm3, %v570_v34, 0.0 }
 0x2a1   :  { %v575_v38 = vadd.f32 %v574_v36, %v573_v35 }
 0x2a3   :  { %576 = vadd.xlane.f32.xlu1 %v575_v38 }
 0x32c   :  { %v577_v21 = vpop.xlane.xlu1 %576 }
 0x32d   :  { %v578_v6 = vrot.slane %v577_v21, 4 }
 0x32f   :  { %v579_v39 = vadd.f32 %v578_v6, %v577_v21 }
 0x331   :  { %v580_v31 = vrot.slane %v579_v39, 2 }
 0x333   :  { %v581_v40 = vadd.f32 %v580_v31, %v579_v39 }
 0x335   :  { %v582_v41 = vrot.slane %v581_v40, 1 }
 0x337   :  { %v583_v0 = vadd.f32 %v582_v41, %v581_v40 }
 0x339   :  { %638 = vpush %v583_v0 }
 0x36a   :  { %s639_s17 = spop %638 }
 0x36b   :  { %v585_v24 = vstv %s639_s17 }
 0x36c   :  { %587 = vst.msk [vmem:[#allocation2] sm:$0x1] %vm586_vm4, %v585_v24 }
 0x36d   :  { %667 = shalt.err (!%p664_p4)
}
 0x36e   :  { %597 = dma.vmem_to_hbm [thread:$0]  %s595_s16, 16, %s844_s7, [#allocation3]  }
 0x36f   :  { %676 = dma.done.wait [#allocation3], 16  }
 0x370   :  { %677 = vsyncadd [#allocation3], 4294967280 }
 0x371   :  { %601 = vsyncpa [#allocation3], 1 }

</bundles_post_ra>
